<compile_context>
chip_gen: v6e
topology: v6e:2x2x1
jax: 0.10.0
libtpu: 0.0.40
codegen_flags: <defaults>
</compile_context>

<pallas_src>
import functools

import jax
import jax.numpy as jnp
from jax.experimental import pallas as pl
from jax.experimental.pallas import tpu as pltpu


def _lstm_gqn_kernel(p_ref, w_ref, b_ref, c_ref, c_out_ref, h_out_ref, *, nb):
    # p_ref : (nb, 25*Cin, H*W)  im2col patches (K on sublanes, pixels on lanes)
    # w_ref : (Cout, 25*Cin)     conv weights, row = output channel (VMEM-resident)
    # b_ref : (Cout, 1)          conv bias (broadcasts along the lane axis)
    # c_ref : (nb, Cout, H*W)    previous cell state (NCHW flattened, lane-dense)
    # outs  : (nb, Cout, H*W)    new cell state c', new hidden h'
    w = w_ref[...]
    b = b_ref[...]
    for i in range(nb):  # statically unrolled; nb is small
        # One big-K matmul on the MXU: (Cout, 25*Cin) x (25*Cin, H*W) -> (Cout, H*W).
        y = jnp.dot(w, p_ref[i], preferred_element_type=jnp.float32) + b
        gate = jax.nn.sigmoid(y)            # forget == input == output gate
        cand = jnp.tanh(y)                  # candidate
        c_new = (c_ref[i] + cand) * gate    # c*gate + cand*gate, one multiply saved
        c_out_ref[i] = c_new.astype(c_out_ref.dtype)
        h_out_ref[i] = (gate * jnp.tanh(c_new)).astype(h_out_ref.dtype)


def lstm_cell_gqn(inp_nchw, h_nchw, c_nchw, weight_hwio, bias, *, batch_block=1):
    """Forward pass of LSTMcellGQN. Returns (c', h') in NCHW like the PyTorch module."""
    N, Ci, H, W = inp_nchw.shape
    Ch = h_nchw.shape[1]
    Cin = Ci + Ch
    Cout = weight_hwio.shape[-1]
    HW = H * W
    K = 25 * Cin
    nb = batch_block
    assert N % nb == 0, "batch_block must divide the batch size"

    # --- glue: all in NCHW (channel-major), no transposes of activations needed ---
    xcat = jnp.concatenate([inp_nchw, h_nchw], axis=1)                  # (N, Cin, H, W)
    xpad = jnp.pad(xcat, ((0, 0), (0, 0), (2, 2), (2, 2)))              # (N, Cin, H+4, W+4)
    # im2col: K ordered tap-major (dh, dw, cin) to match the weight reshape below.
    patches = jnp.concatenate(
        [xpad[:, :, dh:dh + H, dw:dw + W] for dh in range(5) for dw in range(5)],
        axis=1,
    ).reshape(N, K, HW)                                                 # (N, 25*Cin, H*W)
    w_t = jnp.transpose(weight_hwio, (3, 0, 1, 2)).reshape(Cout, K)     # (Cout, 25*Cin)
    b_col = bias.reshape(Cout, 1)
    c_flat = c_nchw.reshape(N, Cout, HW)                                # free reshape

    kernel = functools.partial(_lstm_gqn_kernel, nb=nb)
    c_new, h_new = pl.pallas_call(
        kernel,
        out_shape=(
            jax.ShapeDtypeStruct((N, Cout, HW), jnp.float32),
            jax.ShapeDtypeStruct((N, Cout, HW), jnp.float32),
        ),
        grid_spec=pltpu.PrefetchScalarGridSpec(
            num_scalar_prefetch=0,
            grid=(N // nb,),
            in_specs=[
                pl.BlockSpec((nb, K, HW), lambda n: (n, 0, 0)),
                pl.BlockSpec((Cout, K), lambda n: (0, 0)),     # constant -> stays in VMEM
                pl.BlockSpec((Cout, 1), lambda n: (0, 0)),     # constant -> stays in VMEM
                pl.BlockSpec((nb, Cout, HW), lambda n: (n, 0, 0)),
            ],
            out_specs=[
                pl.BlockSpec((nb, Cout, HW), lambda n: (n, 0, 0)),
                pl.BlockSpec((nb, Cout, HW), lambda n: (n, 0, 0)),
            ],
        ),
        compiler_params=pltpu.CompilerParams(dimension_semantics=("parallel",)),
    )(patches, w_t, b_col, c_flat)

    # (N, Cout, H*W) -> NCHW is a free reshape (no transpose needed).
    return c_new.reshape(N, Cout, H, W), h_new.reshape(N, Cout, H, W)


def _reference(inp_nchw, h_nchw, c_nchw, weight_hwio, bias):
    """Pure-JAX reference of the PyTorch forward (NHWC conv)."""
    x = jnp.concatenate(
        [jnp.transpose(inp_nchw, (0, 2, 3, 1)), jnp.transpose(h_nchw, (0, 2, 3, 1))], axis=-1
    )
    y = jax.lax.conv_general_dilated(
        x, weight_hwio, window_strides=(1, 1), padding=((2, 2), (2, 2)),
        dimension_numbers=("NHWC", "HWIO", "NHWC"),
    ) + bias
    gate = jax.nn.sigmoid(y)
    cand = jnp.tanh(y)
    c_old = jnp.transpose(c_nchw, (0, 2, 3, 1))
    c_new = c_old * gate + cand * gate
    h_new = gate * jnp.tanh(c_new)
    return jnp.transpose(c_new, (0, 3, 1, 2)), jnp.transpose(h_new, (0, 3, 1, 2))


if __name__ == "__main__":
    # Small deterministic setup: batch=2, input_size=4, hidden_size=32, spatial=16x16.
    N, input_size, hidden_size, H, W = 2, 4, 32, 16, 16
    Cin = input_size + hidden_size

    key = jax.random.PRNGKey(0)
    k_x, k_h, k_c, k_w, k_b = jax.random.split(key, 5)

    x = jax.random.normal(k_x, (N, input_size, H, W), dtype=jnp.float32)
    h = jax.random.normal(k_h, (N, hidden_size, H, W), dtype=jnp.float32)
    c = jax.random.normal(k_c, (N, hidden_size, H, W), dtype=jnp.float32)

    # Deterministic init mimicking PyTorch Conv2d default: U(-1/sqrt(fan_in), +1/sqrt(fan_in)).
    fan_in = Cin * 5 * 5
    bound = 1.0 / (fan_in ** 0.5)
    weight_hwio = jax.random.uniform(k_w, (5, 5, Cin, hidden_size),
                                     minval=-bound, maxval=bound, dtype=jnp.float32)
    bias = jax.random.uniform(k_b, (hidden_size,), minval=-bound, maxval=bound,
                              dtype=jnp.float32)

    # batch_block=1 keeps 2 independent "parallel" grid blocks (both v7x TensorCores busy);
    # on v5e/v6e a larger batch_block can amortize per-step pipeline overhead.
    c_new, h_new = lstm_cell_gqn(x, h, c, weight_hwio, bias, batch_block=1)
    jax.block_until_ready((c_new, h_new))

    c_ref, h_ref = _reference(x, h, c, weight_hwio, bias)
    assert jnp.allclose(c_new, c_ref, atol=2e-4, rtol=2e-4), "cell state mismatch"
    assert jnp.allclose(h_new, h_ref, atol=2e-4, rtol=2e-4), "hidden state mismatch"

    print("KERNEL_OK")
</pallas_src>

<mosaic_0001>
module attributes {stable_mosaic.version = 11 : i64} {
  func.func @_lstm_gqn_kernel(%arg0: i32, %arg1: memref<1x900x256xf32, #tpu.memory_space<vmem>>, %arg2: memref<32x900xf32, #tpu.memory_space<vmem>>, %arg3: memref<32x1xf32, #tpu.memory_space<vmem>>, %arg4: memref<1x32x256xf32, #tpu.memory_space<vmem>>, %arg5: memref<1x32x256xf32, #tpu.memory_space<vmem>>, %arg6: memref<1x32x256xf32, #tpu.memory_space<vmem>>) attributes {dimension_semantics = [#tpu.dimension_semantics<parallel>], iteration_bounds = array<i64: 2>, scalar_prefetch = 0 : i64, scratch_operands = 0 : i64, tpu.core_type = #tpu.core_type<tc>, window_params = [{transform_indices = @transform_0, window_bounds = array<i64: 1, 900, 256>}, {pipeline_mode = #tpu.pipeline_mode<synchronous>, transform_indices = @transform_1, window_bounds = array<i64: 32, 900>}, {pipeline_mode = #tpu.pipeline_mode<synchronous>, transform_indices = @transform_2, window_bounds = array<i64: 32, 1>}, {transform_indices = @transform_3, window_bounds = array<i64: 1, 32, 256>}, {transform_indices = @transform_4, window_bounds = array<i64: 1, 32, 256>}, {transform_indices = @transform_5, window_bounds = array<i64: 1, 32, 256>}]} {
    %c0 = arith.constant 0 : index
    %c0_0 = arith.constant 0 : index
    %0 = vector.load %arg2[%c0, %c0_0] : memref<32x900xf32, #tpu.memory_space<vmem>>, vector<32x900xf32>
    %c0_1 = arith.constant 0 : index
    %c0_2 = arith.constant 0 : index
    %1 = vector.load %arg3[%c0_1, %c0_2] : memref<32x1xf32, #tpu.memory_space<vmem>>, vector<32x1xf32>
    %c0_3 = arith.constant 0 : index
    %c0_4 = arith.constant 0 : index
    %c0_5 = arith.constant 0 : index
    %2 = vector.load %arg1[%c0_3, %c0_4, %c0_5] : memref<1x900x256xf32, #tpu.memory_space<vmem>>, vector<1x900x256xf32>
    %3 = vector.shape_cast %2 : vector<1x900x256xf32> to vector<900x256xf32>
    %cst = arith.constant dense<0.000000e+00> : vector<32x256xf32>
    %4 = tpu.matmul %0, %3, %cst {dimension_numbers = #tpu.dot_dimension_numbers<[1], [0], [0], [1], [0, 0, 1, 1], [], []>} : vector<32x900xf32>, vector<900x256xf32>, vector<32x256xf32> -> vector<32x256xf32>
    %5 = vector.broadcast %1 : vector<32x1xf32> to vector<32x256xf32>
    %6 = arith.addf %4, %5 : vector<32x256xf32>
    %7 = arith.negf %6 : vector<32x256xf32>
    %8 = math.exp %7 : vector<32x256xf32>
    %cst_6 = arith.constant 1.000000e+00 : f32
    %9 = vector.broadcast %cst_6 : f32 to vector<32x256xf32>
    %10 = arith.addf %9, %8 : vector<32x256xf32>
    %11 = arith.divf %9, %10 : vector<32x256xf32>
    %12 = math.tanh %6 : vector<32x256xf32>
    %c0_7 = arith.constant 0 : index
    %c0_8 = arith.constant 0 : index
    %c0_9 = arith.constant 0 : index
    %13 = vector.load %arg4[%c0_7, %c0_8, %c0_9] : memref<1x32x256xf32, #tpu.memory_space<vmem>>, vector<1x32x256xf32>
    %14 = vector.shape_cast %13 : vector<1x32x256xf32> to vector<32x256xf32>
    %15 = arith.addf %14, %12 : vector<32x256xf32>
    %16 = arith.mulf %15, %11 : vector<32x256xf32>
    %c0_10 = arith.constant 0 : index
    %c0_11 = arith.constant 0 : index
    %c0_12 = arith.constant 0 : index
    %17 = vector.load %arg5[%c0_10, %c0_11, %c0_12] : memref<1x32x256xf32, #tpu.memory_space<vmem>>, vector<1x32x256xf32>
    %18 = vector.shape_cast %17 : vector<1x32x256xf32> to vector<32x256xf32>
    %19 = vector.shape_cast %16 : vector<32x256xf32> to vector<1x32x256xf32>
    tpu.vector_store %arg5[%c0_10, %c0_11, %c0_12], %19 {strides = array<i32>} : memref<1x32x256xf32, #tpu.memory_space<vmem>>, vector<1x32x256xf32>,
    %20 = math.tanh %16 : vector<32x256xf32>
    %21 = arith.mulf %11, %20 : vector<32x256xf32>
    %c0_13 = arith.constant 0 : index
    %c0_14 = arith.constant 0 : index
    %c0_15 = arith.constant 0 : index
    %22 = vector.load %arg6[%c0_13, %c0_14, %c0_15] : memref<1x32x256xf32, #tpu.memory_space<vmem>>, vector<1x32x256xf32>
    %23 = vector.shape_cast %22 : vector<1x32x256xf32> to vector<32x256xf32>
    %24 = vector.shape_cast %21 : vector<32x256xf32> to vector<1x32x256xf32>
    tpu.vector_store %arg6[%c0_13, %c0_14, %c0_15], %24 {strides = array<i32>} : memref<1x32x256xf32, #tpu.memory_space<vmem>>, vector<1x32x256xf32>,
    return
  }
  func.func @transform_0(%arg0: i32) -> (i32, i32, i32) {
    %c0_i32 = arith.constant 0 : i32
    %c0_i32_0 = arith.constant 0 : i32
    %c0_i32_1 = arith.constant 0 : i32
    return %arg0, %c0_i32, %c0_i32_0 : i32, i32, i32
  }
  func.func @transform_1(%arg0: i32) -> (i32, i32) {
    %c0_i32 = arith.constant 0 : i32
    %c0_i32_0 = arith.constant 0 : i32
    %c0_i32_1 = arith.constant 0 : i32
    return %c0_i32, %c0_i32_0 : i32, i32
  }
  func.func @transform_2(%arg0: i32) -> (i32, i32) {
    %c0_i32 = arith.constant 0 : i32
    %c0_i32_0 = arith.constant 0 : i32
    %c0_i32_1 = arith.constant 0 : i32
    return %c0_i32, %c0_i32_0 : i32, i32
  }
  func.func @transform_3(%arg0: i32) -> (i32, i32, i32) {
    %c0_i32 = arith.constant 0 : i32
    %c0_i32_0 = arith.constant 0 : i32
    %c0_i32_1 = arith.constant 0 : i32
    return %arg0, %c0_i32, %c0_i32_0 : i32, i32, i32
  }
  func.func @transform_4(%arg0: i32) -> (i32, i32, i32) {
    %c0_i32 = arith.constant 0 : i32
    %c0_i32_0 = arith.constant 0 : i32
    %c0_i32_1 = arith.constant 0 : i32
    return %arg0, %c0_i32, %c0_i32_0 : i32, i32, i32
  }
  func.func @transform_5(%arg0: i32) -> (i32, i32, i32) {
    %c0_i32 = arith.constant 0 : i32
    %c0_i32_0 = arith.constant 0 : i32
    %c0_i32_1 = arith.constant 0 : i32
    return %arg0, %c0_i32, %c0_i32_0 : i32, i32, i32
  }
}

</mosaic_0001>

<bundles_post_ra>
// kernel: tpu_custom_call.1
= control target key start
LH: loop header
LB: loop body
LE: loop exit
PB: predicated region body
PF: predicated region fallthrough
CT: control target
= control target key end

     0   :  { %11 = vsyncpa [#allocation3], 0  ;;  %s1977_s0 = inlined_call_operand.vmem [shape: f32[2,900,256], index: 0, kind: input, shape index: {}]   ;;  %s1978_s1 = inlined_call_operand.vmem [shape: f32[32,900], index: 1, kind: input, shape index: {}]   ;;  %s1979_s2 = inlined_call_operand.vmem [shape: f32[32,1], index: 2, kind: input, shape index: {}]   ;;  %s1980_s3 = inlined_call_operand.vmem [shape: f32[2,32,256], index: 3, kind: input, shape index: {}]   ;;  %s1981_s4 = inlined_call_operand.hbm [shape: f32[2,32,256], index: 4, kind: output, shape index: {0}]   ;;  %s1982_s5 = inlined_call_operand.hbm [shape: f32[2,32,256], index: 5, kind: output, shape index: {1}]  }
   0x1   :  { %13 = vsyncpa [#allocation3 + $0x1], 0 }
   0x2   :  { %14 = vsyncpa [#allocation5], 0 }
   0x3   :  { %16 = vsyncpa [#allocation5 + $0x1], 0  ;;  %s1440_s18 = smov 0   ;;  %s1442_s19 = smov 0  }
   0x4   :  { %s1444_s20 = smov 0   ;;  %s1446_s21 = smov 0  }
   0x5 LB: > { %s1461_s22 = sadd.s32 4294967295, %s1403_s21   ;;  %s1165_s23 = sadd.s32 4294967294, %s1403_s21   ;;  %s1403_s21 = sphi %s1446_s21, %s1988_s21   ;;  %s1399_s20 = sphi %s1444_s20, %s1987_s20   ;;  %s1395_s19 = sphi %s1442_s19, %s1986_s19   ;;  %s1391_s18 = sphi %s1440_s18, %s1985_s18  }
   0x6   : > { %s1465_s24 = sadd.s32 1, %s1403_s21   ;;  %s123_s25 = sadd.s32 1, %s1399_s20 }
   0x7   : > { %s120_s26 = ssub.s32 %s1403_s21, %s1465_s24  ;;  %p133_p0 = scmp.ne.s32.totalorder %s1399_s20, %s1395_s19 }
   0x8   : > { %p121_p1 = scmp.eq.s32.totalorder %s120_s26, 0  ;;  %p134_p2 = scmp.eq.s32.totalorder %s1461_s22, 1 }
   0x9   : > { %p139_p3 = scmp.ne.s32.totalorder %s1395_s19, %s1391_s18  ;;  %p140_p4 = scmp.eq.s32.totalorder %s1165_s23, 1 }
   0xa   : > { %s1476_s27 = scalar_select %p121_p1, %s1399_s20, %s123_s25  }
   0xb   : > { %p1478_p5 = por %p134_p2, %p133_p0  ;;  %p1482_p6 = por %p140_p4, %p139_p3 }
   0xc   : > { %p1168_p7 = scmp.ge.s32.totalorder %s1403_s21, 1  ;;  %p206_p8 = scmp.lt.s32.totalorder %s1403_s21, 3 }
   0xe   : > { %p207_p9 = pnand %p1168_p7, %p206_p8 }
   0xf   : > { %p244_p10 = scmp.lt.s32.totalorder (!%p207_p9), %s1461_s22, 1  ;;  %s1845_s15 = sand.u32 (!%p207_p9), 1, %s1395_s19  }
  0x10   : > { %210 = sbr.rel (%p207_p9) target bundleno = 438 (0x1b6), region = 36  ;;  %s1197_s16 = sshll.u32 (!%p207_p9), %s1461_s22, 10 }
  0x11   : > { %s1888_s26 = scalar_lea.hbm (!%p207_p9), %s1981_s4, %s1197_s16  ;;  %s1025_s30 = scalar_lea.sflag (!%p207_p9), [#allocation3], %s1845_s15 }
  0x12   : > { %s1406_s7 = smov (!%p207_p9), [#allocation2]  }
  0x13   : > { %s1317_s8 = sshll.u32 (!%p207_p9), %s1406_s7, 4  ;;  %s1318_s8 = int_to_ptr.vmem [resolvable:$false] %s1317_s8 }
  0x15   : > { %v255_v0 = vld [vmem:[%s1978_s1 + $0x8] sm:$0xff]  ;;  %v257_v1 = vld [vmem:[%s1978_s1 + $0x18] sm:$0xff]  ;;  %s1496_s9 = scalar_select %p244_p10, %s1461_s22, 1  ;;  %vm549_vm0 = vcmask 1043456   ;;  %vm536_vm1 = vcmask 31744  }
  0x16   : > { %620 = vmatprep.mubr.f32.mxu0 %v255_v0  ;;  %709 = vmatprep.mubr.f32.mxu1 %v257_v1 }
  0x17   : > { %s1199_s10 = smul.u32 1808, %s1496_s9 }
  0x19   : > { %s1502_s13 = scalar_lea.vmem %s1977_s0, %s1199_s10  ;;  %s1196_s10 = sshll.u32 %s1496_s9, 6 }
  0x1a   : > { %v321_v2 = vld [vmem:[%s1502_s13 + $0xf8] sm:$0xff]  ;;  %v320_v3 = vld [vmem:[%s1502_s13 + $0xf0] sm:$0xff]  ;;  %v319_v4 = vld [vmem:[%s1502_s13 + $0xe8] sm:$0xff]  ;;  %s1842_s14 = scalar_lea.vmem %s1980_s3, %s1196_s10  ;;  %s1169_s9 = sshll.u32 %s1845_s15, 6 }
  0x1b   : > { %556 = vmatprep.subr.mxu0 %v321_v2  ;;  %v385_v5 = vld [vmem:[%s1502_s13 + $0x2f8] sm:$0xff]  ;;  %v318_v6 = vld [vmem:[%s1502_s13 + $0xe0] sm:$0xff]  ;;  %v384_v7 = vld [vmem:[%s1502_s13 + $0x2f0] sm:$0xff]  ;;  %s1319_s10 = scalar_lea.vmem %s1318_s8, 2048 }
  0x1c   : > { %557 = vmatpush1.msra.mxu0 %v320_v3  ;;  %645 = vmatprep.subr.mxu1 %v385_v5  ;;  %v317_v8 = vld [vmem:[%s1502_s13 + $0xd8] sm:$0xff]  ;;  %v383_v9 = vld [vmem:[%s1502_s13 + $0x2e8] sm:$0xff]  ;;  %v316_v10 = vld [vmem:[%s1502_s13 + $0xd0] sm:$0xff] }
  0x1d   : > { %558 = vmatprep.subr.mxu0 %v319_v4  ;;  %646 = vmatpush1.msra.mxu1 %v384_v7  ;;  %v382_v11 = vld [vmem:[%s1502_s13 + $0x2e0] sm:$0xff]  ;;  %v381_v12 = vld [vmem:[%s1502_s13 + $0x2d8] sm:$0xff]  ;;  %v315_v13 = vld [vmem:[%s1502_s13 + $0xc8] sm:$0xff] }
  0x1e   : > { %559 = vmatpush1.msra.mxu0 %v318_v6  ;;  %647 = vmatprep.subr.mxu1 %v383_v9  ;;  %v380_v14 = vld [vmem:[%s1502_s13 + $0x2d0] sm:$0xff]  ;;  %v314_v15 = vld [vmem:[%s1502_s13 + $0xc0] sm:$0xff]  ;;  %v379_v16 = vld [vmem:[%s1502_s13 + $0x2c8] sm:$0xff] }
  0x1f   : > { %560 = vmatprep.subr.mxu0 %v317_v8  ;;  %648 = vmatpush1.msra.mxu1 %v382_v11  ;;  %v313_v17 = vld [vmem:[%s1502_s13 + $0xb8] sm:$0xff]  ;;  %v378_v18 = vld [vmem:[%s1502_s13 + $0x2c0] sm:$0xff]  ;;  %v312_v19 = vld [vmem:[%s1502_s13 + $0xb0] sm:$0xff] }
  0x20   : > { %561 = vmatpush1.msra.mxu0 %v316_v10  ;;  %649 = vmatprep.subr.mxu1 %v381_v12  ;;  %v377_v20 = vld [vmem:[%s1502_s13 + $0x2b8] sm:$0xff]  ;;  %v311_v21 = vld [vmem:[%s1502_s13 + $0xa8] sm:$0xff]  ;;  %v376_v22 = vld [vmem:[%s1502_s13 + $0x2b0] sm:$0xff] }
  0x21   : > { %562 = vmatprep.subr.mxu0 %v315_v13  ;;  %650 = vmatpush1.msra.mxu1 %v380_v14  ;;  %v310_v23 = vld [vmem:[%s1502_s13 + $0xa0] sm:$0xff]  ;;  %v375_v24 = vld [vmem:[%s1502_s13 + $0x2a8] sm:$0xff]  ;;  %v309_v25 = vld [vmem:[%s1502_s13 + $0x98] sm:$0xff] }
  0x22   : > { %563 = vmatpush1.msra.mxu0 %v314_v15  ;;  %651 = vmatprep.subr.mxu1 %v379_v16  ;;  %v374_v26 = vld [vmem:[%s1502_s13 + $0x2a0] sm:$0xff]  ;;  %v308_v27 = vld [vmem:[%s1502_s13 + $0x90] sm:$0xff]  ;;  %v373_v28 = vld [vmem:[%s1502_s13 + $0x298] sm:$0xff] }
  0x23   : > { %564 = vmatprep.subr.mxu0 %v313_v17  ;;  %652 = vmatpush1.msra.mxu1 %v378_v18  ;;  %v307_v29 = vld [vmem:[%s1502_s13 + $0x88] sm:$0xff]  ;;  %v372_v30 = vld [vmem:[%s1502_s13 + $0x290] sm:$0xff]  ;;  %v306_v31 = vld [vmem:[%s1502_s13 + $0x80] sm:$0xff] }
  0x24   : > { %565 = vmatpush1.msra.mxu0 %v312_v19  ;;  %653 = vmatprep.subr.mxu1 %v377_v20  ;;  %v371_v32 = vld [vmem:[%s1502_s13 + $0x288] sm:$0xff]  ;;  %v305_v33 = vld [vmem:[%s1502_s13 + $0x78] sm:$0xff]  ;;  %v370_v34 = vld [vmem:[%s1502_s13 + $0x280] sm:$0xff] }
  0x25   : > { %566 = vmatprep.subr.mxu0 %v311_v21  ;;  %654 = vmatpush1.msra.mxu1 %v376_v22  ;;  %v304_v35 = vld [vmem:[%s1502_s13 + $0x70] sm:$0xff]  ;;  %v369_v36 = vld [vmem:[%s1502_s13 + $0x278] sm:$0xff]  ;;  %v303_v37 = vld [vmem:[%s1502_s13 + $0x68] sm:$0xff] }
  0x26   : > { %567 = vmatpush1.msra.mxu0 %v310_v23  ;;  %655 = vmatprep.subr.mxu1 %v375_v24  ;;  %v368_v38 = vld [vmem:[%s1502_s13 + $0x270] sm:$0xff]  ;;  %v302_v39 = vld [vmem:[%s1502_s13 + $0x60] sm:$0xff]  ;;  %v367_v40 = vld [vmem:[%s1502_s13 + $0x268] sm:$0xff] }
  0x27   : > { %568 = vmatprep.subr.mxu0 %v309_v25  ;;  %656 = vmatpush1.msra.mxu1 %v374_v26  ;;  %v301_v41 = vld [vmem:[%s1502_s13 + $0x58] sm:$0xff]  ;;  %v366_v42 = vld [vmem:[%s1502_s13 + $0x260] sm:$0xff]  ;;  %v300_v43 = vld [vmem:[%s1502_s13 + $0x50] sm:$0xff] }
  0x28   : > { %569 = vmatpush1.msra.mxu0 %v308_v27  ;;  %657 = vmatprep.subr.mxu1 %v373_v28  ;;  %v365_v44 = vld [vmem:[%s1502_s13 + $0x258] sm:$0xff]  ;;  %v299_v45 = vld [vmem:[%s1502_s13 + $0x48] sm:$0xff]  ;;  %v364_v46 = vld [vmem:[%s1502_s13 + $0x250] sm:$0xff] }
  0x29   : > { %570 = vmatprep.subr.mxu0 %v307_v29  ;;  %658 = vmatpush1.msra.mxu1 %v372_v30  ;;  %v298_v47 = vld [vmem:[%s1502_s13 + $0x40] sm:$0xff]  ;;  %v363_v48 = vld [vmem:[%s1502_s13 + $0x248] sm:$0xff]  ;;  %v297_v49 = vld [vmem:[%s1502_s13 + $0x38] sm:$0xff] }
  0x2a   : > { %571 = vmatpush1.msra.mxu0 %v306_v31  ;;  %659 = vmatprep.subr.mxu1 %v371_v32  ;;  %v362_v50 = vld [vmem:[%s1502_s13 + $0x240] sm:$0xff]  ;;  %v296_v51 = vld [vmem:[%s1502_s13 + $0x30] sm:$0xff]  ;;  %v361_v52 = vld [vmem:[%s1502_s13 + $0x238] sm:$0xff] }
  0x2b   : > { %572 = vmatprep.subr.mxu0 %v305_v33  ;;  %660 = vmatpush1.msra.mxu1 %v370_v34  ;;  %v295_v53 = vld [vmem:[%s1502_s13 + $0x28] sm:$0xff]  ;;  %v360_v54 = vld [vmem:[%s1502_s13 + $0x230] sm:$0xff]  ;;  %v294_v55 = vld [vmem:[%s1502_s13 + $0x20] sm:$0xff] }
  0x2c   : > { %573 = vmatpush1.msra.mxu0 %v304_v35  ;;  %661 = vmatprep.subr.mxu1 %v369_v36  ;;  %v359_v56 = vld [vmem:[%s1502_s13 + $0x228] sm:$0xff]  ;;  %v293_v57 = vld [vmem:[%s1502_s13 + $0x18] sm:$0xff]  ;;  %v358_v58 = vld [vmem:[%s1502_s13 + $0x220] sm:$0xff] }
  0x2d   : > { %574 = vmatprep.subr.mxu0 %v303_v37  ;;  %662 = vmatpush1.msra.mxu1 %v368_v38  ;;  %v292_v59 = vld [vmem:[%s1502_s13 + $0x10] sm:$0xff]  ;;  %v357_v60 = vld [vmem:[%s1502_s13 + $0x218] sm:$0xff]  ;;  %v291_v61 = vld [vmem:[%s1502_s13 + $0x8] sm:$0xff] }
  0x2e   : > { %575 = vmatpush1.msra.mxu0 %v302_v39  ;;  %663 = vmatprep.subr.mxu1 %v367_v40  ;;  %v356_v62 = vld [vmem:[%s1502_s13 + $0x210] sm:$0xff]  ;;  %v290_v63 = vld [vmem:[%s1502_s13] sm:$0xff]  ;;  %v355_v0 = vld [vmem:[%s1502_s13 + $0x208] sm:$0xff] }
  0x2f   : > { %576 = vmatprep.subr.mxu0 %v301_v41  ;;  %664 = vmatpush1.msra.mxu1 %v366_v42  ;;  %v353_v1 = vld [vmem:[%s1502_s13 + $0x1f8] sm:$0xff]  ;;  %v354_v2 = vld [vmem:[%s1502_s13 + $0x200] sm:$0xff]  ;;  %v352_v3 = vld [vmem:[%s1502_s13 + $0x1f0] sm:$0xff] }
  0x30   : > { %577 = vmatpush1.msra.mxu0 %v300_v43  ;;  %665 = vmatprep.subr.mxu1 %v365_v44  ;;  %v417_v4 = vld [vmem:[%s1502_s13 + $0x3f8] sm:$0xff]  ;;  %v351_v5 = vld [vmem:[%s1502_s13 + $0x1e8] sm:$0xff]  ;;  %v416_v6 = vld [vmem:[%s1502_s13 + $0x3f0] sm:$0xff] }
  0x31   : > { %578 = vmatprep.subr.mxu0 %v299_v45  ;;  %666 = vmatpush1.msra.mxu1 %v364_v46  ;;  %v350_v7 = vld [vmem:[%s1502_s13 + $0x1e0] sm:$0xff]  ;;  %v415_v8 = vld [vmem:[%s1502_s13 + $0x3e8] sm:$0xff]  ;;  %v349_v9 = vld [vmem:[%s1502_s13 + $0x1d8] sm:$0xff] }
  0x32   : > { %579 = vmatpush1.msra.mxu0 %v298_v47  ;;  %667 = vmatprep.subr.mxu1 %v363_v48  ;;  %v414_v10 = vld [vmem:[%s1502_s13 + $0x3e0] sm:$0xff]  ;;  %v348_v11 = vld [vmem:[%s1502_s13 + $0x1d0] sm:$0xff]  ;;  %v413_v12 = vld [vmem:[%s1502_s13 + $0x3d8] sm:$0xff] }
  0x33   : > { %580 = vmatprep.subr.mxu0 %v297_v49  ;;  %668 = vmatpush1.msra.mxu1 %v362_v50  ;;  %v347_v13 = vld [vmem:[%s1502_s13 + $0x1c8] sm:$0xff]  ;;  %v412_v14 = vld [vmem:[%s1502_s13 + $0x3d0] sm:$0xff]  ;;  %v346_v15 = vld [vmem:[%s1502_s13 + $0x1c0] sm:$0xff] }
  0x34   : > { %581 = vmatpush1.msra.mxu0 %v296_v51  ;;  %669 = vmatprep.subr.mxu1 %v361_v52  ;;  %v411_v16 = vld [vmem:[%s1502_s13 + $0x3c8] sm:$0xff]  ;;  %v345_v17 = vld [vmem:[%s1502_s13 + $0x1b8] sm:$0xff]  ;;  %v410_v18 = vld [vmem:[%s1502_s13 + $0x3c0] sm:$0xff] }
  0x35   : > { %582 = vmatprep.subr.mxu0 %v295_v53  ;;  %670 = vmatpush1.msra.mxu1 %v360_v54  ;;  %v344_v19 = vld [vmem:[%s1502_s13 + $0x1b0] sm:$0xff]  ;;  %v409_v20 = vld [vmem:[%s1502_s13 + $0x3b8] sm:$0xff]  ;;  %v343_v21 = vld [vmem:[%s1502_s13 + $0x1a8] sm:$0xff] }
  0x36   : > { %583 = vmatpush1.msra.mxu0 %v294_v55  ;;  %671 = vmatprep.subr.mxu1 %v359_v56  ;;  %v408_v22 = vld [vmem:[%s1502_s13 + $0x3b0] sm:$0xff]  ;;  %v342_v23 = vld [vmem:[%s1502_s13 + $0x1a0] sm:$0xff]  ;;  %v407_v24 = vld [vmem:[%s1502_s13 + $0x3a8] sm:$0xff] }
  0x37   : > { %584 = vmatprep.subr.mxu0 %v293_v57  ;;  %672 = vmatpush1.msra.mxu1 %v358_v58  ;;  %v341_v25 = vld [vmem:[%s1502_s13 + $0x198] sm:$0xff]  ;;  %v406_v26 = vld [vmem:[%s1502_s13 + $0x3a0] sm:$0xff]  ;;  %v340_v27 = vld [vmem:[%s1502_s13 + $0x190] sm:$0xff] }
  0x38   : > { %585 = vmatpush1.msra.mxu0 %v292_v59  ;;  %673 = vmatprep.subr.mxu1 %v357_v60  ;;  %v405_v28 = vld [vmem:[%s1502_s13 + $0x398] sm:$0xff]  ;;  %v339_v29 = vld [vmem:[%s1502_s13 + $0x188] sm:$0xff]  ;;  %v404_v30 = vld [vmem:[%s1502_s13 + $0x390] sm:$0xff] }
  0x39   : > { %586 = vmatprep.subr.mxu0 %v291_v61  ;;  %674 = vmatpush1.msra.mxu1 %v356_v62  ;;  %v338_v31 = vld [vmem:[%s1502_s13 + $0x180] sm:$0xff]  ;;  %v403_v32 = vld [vmem:[%s1502_s13 + $0x388] sm:$0xff]  ;;  %v337_v33 = vld [vmem:[%s1502_s13 + $0x178] sm:$0xff] }
  0x3a   : > { %587 = vmatpush1.msra.mxu0 %v290_v63  ;;  %675 = vmatprep.subr.mxu1 %v355_v0  ;;  %v402_v34 = vld [vmem:[%s1502_s13 + $0x380] sm:$0xff]  ;;  %v336_v35 = vld [vmem:[%s1502_s13 + $0x170] sm:$0xff]  ;;  %v401_v36 = vld [vmem:[%s1502_s13 + $0x378] sm:$0xff] }
  0x3b   : > { %588 = vmatprep.subr.mxu0 %v353_v1  ;;  %676 = vmatpush1.msra.mxu1 %v354_v2  ;;  %v335_v37 = vld [vmem:[%s1502_s13 + $0x168] sm:$0xff]  ;;  %v400_v38 = vld [vmem:[%s1502_s13 + $0x370] sm:$0xff]  ;;  %v334_v39 = vld [vmem:[%s1502_s13 + $0x160] sm:$0xff] }
  0x3c   : > { %589 = vmatpush2.msra.mxu0 %v352_v3  ;;  %677 = vmatprep.subr.mxu1 %v417_v4  ;;  %v399_v40 = vld [vmem:[%s1502_s13 + $0x368] sm:$0xff]  ;;  %v333_v41 = vld [vmem:[%s1502_s13 + $0x158] sm:$0xff]  ;;  %v398_v42 = vld [vmem:[%s1502_s13 + $0x360] sm:$0xff] }
  0x3d   : > { %590 = vmatprep.subr.mxu0 %v351_v5  ;;  %678 = vmatpush2.msra.mxu1 %v416_v6  ;;  %v332_v43 = vld [vmem:[%s1502_s13 + $0x150] sm:$0xff]  ;;  %v397_v44 = vld [vmem:[%s1502_s13 + $0x358] sm:$0xff]  ;;  %v331_v45 = vld [vmem:[%s1502_s13 + $0x148] sm:$0xff] }
  0x3e   : > { %591 = vmatpush2.msra.mxu0 %v350_v7  ;;  %679 = vmatprep.subr.mxu1 %v415_v8  ;;  %v396_v46 = vld [vmem:[%s1502_s13 + $0x350] sm:$0xff]  ;;  %v330_v47 = vld [vmem:[%s1502_s13 + $0x140] sm:$0xff]  ;;  %v395_v48 = vld [vmem:[%s1502_s13 + $0x348] sm:$0xff] }
  0x3f   : > { %592 = vmatprep.subr.mxu0 %v349_v9  ;;  %680 = vmatpush2.msra.mxu1 %v414_v10  ;;  %v329_v49 = vld [vmem:[%s1502_s13 + $0x138] sm:$0xff]  ;;  %v394_v50 = vld [vmem:[%s1502_s13 + $0x340] sm:$0xff]  ;;  %v328_v51 = vld [vmem:[%s1502_s13 + $0x130] sm:$0xff] }
  0x40   : > { %593 = vmatpush2.msra.mxu0 %v348_v11  ;;  %681 = vmatprep.subr.mxu1 %v413_v12  ;;  %v393_v52 = vld [vmem:[%s1502_s13 + $0x338] sm:$0xff]  ;;  %v327_v53 = vld [vmem:[%s1502_s13 + $0x128] sm:$0xff]  ;;  %v392_v54 = vld [vmem:[%s1502_s13 + $0x330] sm:$0xff] }
  0x41   : > { %594 = vmatprep.subr.mxu0 %v347_v13  ;;  %682 = vmatpush2.msra.mxu1 %v412_v14  ;;  %v326_v55 = vld [vmem:[%s1502_s13 + $0x120] sm:$0xff]  ;;  %v391_v56 = vld [vmem:[%s1502_s13 + $0x328] sm:$0xff]  ;;  %v325_v57 = vld [vmem:[%s1502_s13 + $0x118] sm:$0xff] }
  0x42   : > { %595 = vmatpush2.msra.mxu0 %v346_v15  ;;  %683 = vmatprep.subr.mxu1 %v411_v16  ;;  %v390_v58 = vld [vmem:[%s1502_s13 + $0x320] sm:$0xff]  ;;  %v324_v59 = vld [vmem:[%s1502_s13 + $0x110] sm:$0xff]  ;;  %v389_v60 = vld [vmem:[%s1502_s13 + $0x318] sm:$0xff] }
  0x43   : > { %596 = vmatprep.subr.mxu0 %v345_v17  ;;  %684 = vmatpush2.msra.mxu1 %v410_v18  ;;  %v323_v61 = vld [vmem:[%s1502_s13 + $0x108] sm:$0xff]  ;;  %v388_v62 = vld [vmem:[%s1502_s13 + $0x310] sm:$0xff]  ;;  %v322_v63 = vld [vmem:[%s1502_s13 + $0x100] sm:$0xff] }
  0x44   : > { %597 = vmatpush2.msra.mxu0 %v344_v19  ;;  %685 = vmatprep.subr.mxu1 %v409_v20  ;;  %v387_v0 = vld [vmem:[%s1502_s13 + $0x308] sm:$0xff]  ;;  %v254_v1 = vld [vmem:[%s1978_s1] sm:$0xff]  ;;  %v449_v2 = vld [vmem:[%s1502_s13 + $0x4f8] sm:$0xff] }
  0x45   : > { %598 = vmatprep.subr.mxu0 %v343_v21  ;;  %686 = vmatpush2.msra.mxu1 %v408_v22  ;;  %v386_v3 = vld [vmem:[%s1502_s13 + $0x300] sm:$0xff]  ;;  %v448_v4 = vld [vmem:[%s1502_s13 + $0x4f0] sm:$0xff]  ;;  %v447_v6 = vld [vmem:[%s1502_s13 + $0x4e8] sm:$0xff] }
  0x46   : > { %599 = vmatpush2.msra.mxu0 %v342_v23  ;;  %687 = vmatprep.subr.mxu1 %v407_v24  ;;  %v256_v5 = vld [vmem:[%s1978_s1 + $0x10] sm:$0xff]  ;;  %v446_v7 = vld [vmem:[%s1502_s13 + $0x4e0] sm:$0xff]  ;;  %v513_v8 = vld [vmem:[%s1502_s13 + $0x6f8] sm:$0xff] }
  0x47   : > { %600 = vmatprep.subr.mxu0 %v341_v25  ;;  %688 = vmatpush2.msra.mxu1 %v406_v26  ;;  %v445_v9 = vld [vmem:[%s1502_s13 + $0x4d8] sm:$0xff]  ;;  %v512_v10 = vld [vmem:[%s1502_s13 + $0x6f0] sm:$0xff]  ;;  %v511_v12 = vld [vmem:[%s1502_s13 + $0x6e8] sm:$0xff] }
  0x48   : > { %601 = vmatpush2.msra.mxu0 %v340_v27  ;;  %689 = vmatprep.subr.mxu1 %v405_v28  ;;  %v444_v11 = vld [vmem:[%s1502_s13 + $0x4d0] sm:$0xff]  ;;  %v443_v13 = vld [vmem:[%s1502_s13 + $0x4c8] sm:$0xff]  ;;  %v510_v14 = vld [vmem:[%s1502_s13 + $0x6e0] sm:$0xff] }
  0x49   : > { %602 = vmatprep.subr.mxu0 %v339_v29  ;;  %690 = vmatpush2.msra.mxu1 %v404_v30  ;;  %v442_v15 = vld [vmem:[%s1502_s13 + $0x4c0] sm:$0xff]  ;;  %v509_v16 = vld [vmem:[%s1502_s13 + $0x6d8] sm:$0xff]  ;;  %v508_v18 = vld [vmem:[%s1502_s13 + $0x6d0] sm:$0xff] }
  0x4a   : > { %603 = vmatpush2.msra.mxu0 %v338_v31  ;;  %691 = vmatprep.subr.mxu1 %v403_v32  ;;  %v441_v17 = vld [vmem:[%s1502_s13 + $0x4b8] sm:$0xff]  ;;  %v440_v19 = vld [vmem:[%s1502_s13 + $0x4b0] sm:$0xff]  ;;  %v507_v20 = vld [vmem:[%s1502_s13 + $0x6c8] sm:$0xff] }
  0x4b   : > { %604 = vmatprep.subr.mxu0 %v337_v33  ;;  %692 = vmatpush2.msra.mxu1 %v402_v34  ;;  %v439_v21 = vld [vmem:[%s1502_s13 + $0x4a8] sm:$0xff]  ;;  %v506_v22 = vld [vmem:[%s1502_s13 + $0x6c0] sm:$0xff]  ;;  %v505_v24 = vld [vmem:[%s1502_s13 + $0x6b8] sm:$0xff] }
  0x4c   : > { %605 = vmatpush2.msra.mxu0 %v336_v35  ;;  %693 = vmatprep.subr.mxu1 %v401_v36  ;;  %v438_v23 = vld [vmem:[%s1502_s13 + $0x4a0] sm:$0xff]  ;;  %v437_v25 = vld [vmem:[%s1502_s13 + $0x498] sm:$0xff]  ;;  %v504_v26 = vld [vmem:[%s1502_s13 + $0x6b0] sm:$0xff] }
  0x4d   : > { %606 = vmatprep.subr.mxu0 %v335_v37  ;;  %694 = vmatpush2.msra.mxu1 %v400_v38  ;;  %v436_v27 = vld [vmem:[%s1502_s13 + $0x490] sm:$0xff]  ;;  %v503_v28 = vld [vmem:[%s1502_s13 + $0x6a8] sm:$0xff]  ;;  %v502_v30 = vld [vmem:[%s1502_s13 + $0x6a0] sm:$0xff] }
  0x4e   : > { %607 = vmatpush2.msra.mxu0 %v334_v39  ;;  %695 = vmatprep.subr.mxu1 %v399_v40  ;;  %v435_v29 = vld [vmem:[%s1502_s13 + $0x488] sm:$0xff]  ;;  %v434_v31 = vld [vmem:[%s1502_s13 + $0x480] sm:$0xff]  ;;  %v501_v32 = vld [vmem:[%s1502_s13 + $0x698] sm:$0xff] }
  0x4f   : > { %608 = vmatprep.subr.mxu0 %v333_v41  ;;  %696 = vmatpush2.msra.mxu1 %v398_v42  ;;  %v433_v33 = vld [vmem:[%s1502_s13 + $0x478] sm:$0xff]  ;;  %v500_v34 = vld [vmem:[%s1502_s13 + $0x690] sm:$0xff]  ;;  %v499_v36 = vld [vmem:[%s1502_s13 + $0x688] sm:$0xff] }
  0x50   : > { %609 = vmatpush2.msra.mxu0 %v332_v43  ;;  %697 = vmatprep.subr.mxu1 %v397_v44  ;;  %v432_v35 = vld [vmem:[%s1502_s13 + $0x470] sm:$0xff]  ;;  %v431_v37 = vld [vmem:[%s1502_s13 + $0x468] sm:$0xff]  ;;  %v498_v38 = vld [vmem:[%s1502_s13 + $0x680] sm:$0xff] }
  0x51   : > { %610 = vmatprep.subr.mxu0 %v331_v45  ;;  %698 = vmatpush2.msra.mxu1 %v396_v46  ;;  %v430_v39 = vld [vmem:[%s1502_s13 + $0x460] sm:$0xff]  ;;  %v497_v40 = vld [vmem:[%s1502_s13 + $0x678] sm:$0xff]  ;;  %v496_v42 = vld [vmem:[%s1502_s13 + $0x670] sm:$0xff] }
  0x52   : > { %611 = vmatpush2.msra.mxu0 %v330_v47  ;;  %699 = vmatprep.subr.mxu1 %v395_v48  ;;  %v429_v41 = vld [vmem:[%s1502_s13 + $0x458] sm:$0xff]  ;;  %v428_v43 = vld [vmem:[%s1502_s13 + $0x450] sm:$0xff]  ;;  %v495_v44 = vld [vmem:[%s1502_s13 + $0x668] sm:$0xff] }
  0x53   : > { %612 = vmatprep.subr.mxu0 %v329_v49  ;;  %700 = vmatpush2.msra.mxu1 %v394_v50  ;;  %v427_v45 = vld [vmem:[%s1502_s13 + $0x448] sm:$0xff]  ;;  %v426_v47 = vld [vmem:[%s1502_s13 + $0x440] sm:$0xff]  ;;  %v425_v49 = vld [vmem:[%s1502_s13 + $0x438] sm:$0xff] }
  0x54   : > { %613 = vmatpush2.msra.mxu0 %v328_v51  ;;  %701 = vmatprep.subr.mxu1 %v393_v52  ;;  %v263_v46 = vld [vmem:[%s1978_s1 + $0x48] sm:$0xff]  ;;  %v494_v48 = vld [vmem:[%s1502_s13 + $0x660] sm:$0xff]  ;;  %v424_v51 = vld [vmem:[%s1502_s13 + $0x430] sm:$0xff] }
  0x55   : > { %614 = vmatprep.subr.mxu0 %v327_v53  ;;  %702 = vmatpush2.msra.mxu1 %v392_v54  ;;  %v262_v50 = vld [vmem:[%s1978_s1 + $0x40] sm:$0xff]  ;;  %v493_v52 = vld [vmem:[%s1502_s13 + $0x658] sm:$0xff]  ;;  %v423_v53 = vld [vmem:[%s1502_s13 + $0x428] sm:$0xff] }
  0x56   : > { %615 = vmatpush2.msra.mxu0 %v326_v55  ;;  %703 = vmatprep.subr.mxu1 %v391_v56  ;;  %v265_v54 = vld [vmem:[%s1978_s1 + $0x58] sm:$0xff]  ;;  %v422_v55 = vld [vmem:[%s1502_s13 + $0x420] sm:$0xff]  ;;  %v492_v56 = vld [vmem:[%s1502_s13 + $0x650] sm:$0xff] }
  0x57   : > { %616 = vmatprep.subr.mxu0 %v325_v57  ;;  %704 = vmatpush2.msra.mxu1 %v390_v58  ;;  %v421_v57 = vld [vmem:[%s1502_s13 + $0x418] sm:$0xff]  ;;  %v264_v58 = vld [vmem:[%s1978_s1 + $0x50] sm:$0xff] }
  0x58   : > { %617 = vmatpush2.msra.mxu0 %v324_v59  ;;  %705 = vmatprep.subr.mxu1 %v389_v60  ;;  %v420_v59 = vld [vmem:[%s1502_s13 + $0x410] sm:$0xff]  ;;  %v491_v60 = vld [vmem:[%s1502_s13 + $0x648] sm:$0xff] }
  0x59   : > { %618 = vmatprep.subr.mxu0 %v323_v61  ;;  %706 = vmatpush2.msra.mxu1 %v388_v62  ;;  %v419_v61 = vld [vmem:[%s1502_s13 + $0x408] sm:$0xff] }
  0x5a   : > { %619 = vmatpush2.msra.mxu0 %v322_v63  ;;  %707 = vmatprep.subr.mxu1 %v387_v0  ;;  %v271_v62 = vld [vmem:[%s1978_s1 + $0x88] sm:$0xff]  ;;  %v418_v63 = vld [vmem:[%s1502_s13 + $0x400] sm:$0xff] }
  0x5b   : > { %621 = vmatmul.mubr.f32.vlgmr.msra.gmra.mxu0 %v254_v1  ;;  %734 = vmatprep.subr.mxu0 %v449_v2  ;;  %v490_v0 = vld [vmem:[%s1502_s13 + $0x640] sm:$0xff]  ;;  %v481_v1 = vld [vmem:[%s1502_s13 + $0x5f8] sm:$0xff] }
  0x5c   : > { %708 = vmatpush2.msra.mxu1 %v386_v3  ;;  %735 = vmatpush1.msra.mxu0 %v448_v4  ;;  %v270_v2 = vld [vmem:[%s1978_s1 + $0x80] sm:$0xff]  ;;  %v480_v3 = vld [vmem:[%s1502_s13 + $0x5f0] sm:$0xff]  ;;  %v489_v4 = vld [vmem:[%s1502_s13 + $0x638] sm:$0xff] }
  0x5d   : > { %710 = vmatmul.mubr.f32.vlgmr.msra.gmra.mxu1 %v256_v5  ;;  %736 = vmatprep.subr.mxu0 %v447_v6  ;;  %v479_v5 = vld [vmem:[%s1502_s13 + $0x5e8] sm:$0xff]  ;;  %v273_v6 = vld [vmem:[%s1978_s1 + $0x98] sm:$0xff] }
  0x5e   : > { %737 = vmatpush1.msra.mxu0 %v446_v7  ;;  %823 = vmatprep.subr.mxu1 %v513_v8  ;;  %v478_v7 = vld [vmem:[%s1502_s13 + $0x5e0] sm:$0xff]  ;;  %v488_v8 = vld [vmem:[%s1502_s13 + $0x630] sm:$0xff] }
  0x5f   : > { %738 = vmatprep.subr.mxu0 %v445_v9  ;;  %824 = vmatpush1.msra.mxu1 %v512_v10  ;;  %v477_v9 = vld [vmem:[%s1502_s13 + $0x5d8] sm:$0xff]  ;;  %v272_v10 = vld [vmem:[%s1978_s1 + $0x90] sm:$0xff] }
  0x60   : > { %739 = vmatpush1.msra.mxu0 %v444_v11  ;;  %825 = vmatprep.subr.mxu1 %v511_v12  ;;  %v476_v11 = vld [vmem:[%s1502_s13 + $0x5d0] sm:$0xff]  ;;  %v487_v12 = vld [vmem:[%s1502_s13 + $0x628] sm:$0xff] }
  0x61   : > { %740 = vmatprep.subr.mxu0 %v443_v13  ;;  %826 = vmatpush1.msra.mxu1 %v510_v14  ;;  %v475_v13 = vld [vmem:[%s1502_s13 + $0x5c8] sm:$0xff] }
  0x62   : > { %741 = vmatpush1.msra.mxu0 %v442_v15  ;;  %827 = vmatprep.subr.mxu1 %v509_v16  ;;  %v279_v14 = vld [vmem:[%s1978_s1 + $0xc8] sm:$0xff]  ;;  %v474_v15 = vld [vmem:[%s1502_s13 + $0x5c0] sm:$0xff] }
  0x63   : > { %742 = vmatprep.subr.mxu0 %v441_v17  ;;  %828 = vmatpush1.msra.mxu1 %v508_v18  ;;  %v486_v16 = vld [vmem:[%s1502_s13 + $0x620] sm:$0xff]  ;;  %v473_v17 = vld [vmem:[%s1502_s13 + $0x5b8] sm:$0xff] }
  0x64   : > { %743 = vmatpush1.msra.mxu0 %v440_v19  ;;  %829 = vmatprep.subr.mxu1 %v507_v20  ;;  %v278_v18 = vld [vmem:[%s1978_s1 + $0xc0] sm:$0xff]  ;;  %v472_v19 = vld [vmem:[%s1502_s13 + $0x5b0] sm:$0xff]  ;;  %v485_v20 = vld [vmem:[%s1502_s13 + $0x618] sm:$0xff] }
  0x65   : > { %744 = vmatprep.subr.mxu0 %v439_v21  ;;  %830 = vmatpush1.msra.mxu1 %v506_v22  ;;  %v471_v21 = vld [vmem:[%s1502_s13 + $0x5a8] sm:$0xff]  ;;  %v281_v22 = vld [vmem:[%s1978_s1 + $0xd8] sm:$0xff] }
  0x66   : > { %745 = vmatpush1.msra.mxu0 %v438_v23  ;;  %831 = vmatprep.subr.mxu1 %v505_v24  ;;  %v470_v23 = vld [vmem:[%s1502_s13 + $0x5a0] sm:$0xff]  ;;  %v484_v24 = vld [vmem:[%s1502_s13 + $0x610] sm:$0xff] }
  0x67   : > { %746 = vmatprep.subr.mxu0 %v437_v25  ;;  %832 = vmatpush1.msra.mxu1 %v504_v26  ;;  %v469_v25 = vld [vmem:[%s1502_s13 + $0x598] sm:$0xff]  ;;  %v280_v26 = vld [vmem:[%s1978_s1 + $0xd0] sm:$0xff] }
  0x68   : > { %747 = vmatpush1.msra.mxu0 %v436_v27  ;;  %833 = vmatprep.subr.mxu1 %v503_v28  ;;  %v468_v27 = vld [vmem:[%s1502_s13 + $0x590] sm:$0xff]  ;;  %v483_v28 = vld [vmem:[%s1502_s13 + $0x608] sm:$0xff] }
  0x69   : > { %748 = vmatprep.subr.mxu0 %v435_v29  ;;  %834 = vmatpush1.msra.mxu1 %v502_v30  ;;  %v467_v29 = vld [vmem:[%s1502_s13 + $0x588] sm:$0xff]  ;;  %v482_v30 = vld [vmem:[%s1502_s13 + $0x600] sm:$0xff] }
  0x6a   : > { %749 = vmatpush1.msra.mxu0 %v434_v31  ;;  %835 = vmatprep.subr.mxu1 %v501_v32  ;;  %v466_v31 = vld [vmem:[%s1502_s13 + $0x580] sm:$0xff]  ;;  %v515_v32 = vld [vmem:[%s1502_s13 + $0x708] sm:$0xf] }
  0x6b   : > { %750 = vmatprep.subr.mxu0 %v433_v33  ;;  %836 = vmatpush1.msra.mxu1 %v500_v34  ;;  %v465_v33 = vld [vmem:[%s1502_s13 + $0x578] sm:$0xff]  ;;  %v259_v34 = vld [vmem:[%s1978_s1 + $0x28] sm:$0xff] }
  0x6c   : > { %751 = vmatpush1.msra.mxu0 %v432_v35  ;;  %837 = vmatprep.subr.mxu1 %v499_v36  ;;  %v464_v35 = vld [vmem:[%s1502_s13 + $0x570] sm:$0xff]  ;;  %v514_v36 = vld [vmem:[%s1502_s13 + $0x700] sm:$0xf] }
  0x6d   : > { %752 = vmatprep.subr.mxu0 %v431_v37  ;;  %838 = vmatpush1.msra.mxu1 %v498_v38  ;;  %v463_v37 = vld [vmem:[%s1502_s13 + $0x568] sm:$0xff]  ;;  %v261_v38 = vld [vmem:[%s1978_s1 + $0x38] sm:$0xff] }
  0x6e   : > { %753 = vmatpush1.msra.mxu0 %v430_v39  ;;  %839 = vmatprep.subr.mxu1 %v497_v40  ;;  %v462_v39 = vld [vmem:[%s1502_s13 + $0x560] sm:$0xff]  ;;  %v260_v40 = vld [vmem:[%s1978_s1 + $0x30] sm:$0xff] }
  0x6f   : > { %754 = vmatprep.subr.mxu0 %v429_v41  ;;  %840 = vmatpush1.msra.mxu1 %v496_v42  ;;  %v461_v41 = vld [vmem:[%s1502_s13 + $0x558] sm:$0xff] }
  0x70   : > { %755 = vmatpush1.msra.mxu0 %v428_v43  ;;  %841 = vmatprep.subr.mxu1 %v495_v44  ;;  %v269_v42 = vld [vmem:[%s1978_s1 + $0x78] sm:$0xff]  ;;  %v460_v43 = vld [vmem:[%s1502_s13 + $0x550] sm:$0xff]  ;;  %v459_v44 = vld [vmem:[%s1502_s13 + $0x548] sm:$0xff] }
  0x71   : > { %756 = vmatprep.subr.mxu0 %v427_v45  ;;  %626 = vmatprep.mubr.f32.mxu0 %v263_v46  ;;  %v286_v45 = vld [vmem:[%s1979_s2] sm:$0xff] }
  0x72   : > { %757 = vmatpush1.msra.mxu0 %v426_v47  ;;  %842 = vmatpush1.msra.mxu1 %v494_v48  ;;  %v458_v46 = vld [vmem:[%s1502_s13 + $0x540] sm:$0xff]  ;;  %v268_v47 = vld [vmem:[%s1978_s1 + $0x70] sm:$0xff]  ;;  %v457_v48 = vld [vmem:[%s1502_s13 + $0x538] sm:$0xff] }
  0x73   : > { %758 = vmatprep.subr.mxu0 %v425_v49  ;;  %627 = vmatmul.mubr.f32.gmra.mxu0 %v262_v50  ;;  %v1405_v49 = vmov 0   ;;  %v277_v50 = vld [vmem:[%s1978_s1 + $0xb8] sm:$0xff] }
  0x74   : > { %759 = vmatpush1.msra.mxu0 %v424_v51  ;;  %843 = vmatprep.subr.mxu1 %v493_v52  ;;  %v456_v51 = vld [vmem:[%s1502_s13 + $0x530] sm:$0xff]  ;;  %v455_v52 = vld [vmem:[%s1502_s13 + $0x528] sm:$0xff] }
  0x75   : > { %760 = vmatprep.subr.mxu0 %v423_v53  ;;  %715 = vmatprep.mubr.f32.mxu1 %v265_v54  ;;  %v287_v53 = vld [vmem:[%s1979_s2 + $0x8] sm:$0xff]  ;;  %v454_v54 = vld [vmem:[%s1502_s13 + $0x520] sm:$0xff] }
  0x76   : > { %761 = vmatpush1.msra.mxu0 %v422_v55  ;;  %844 = vmatpush1.msra.mxu1 %v492_v56  ;;  %v276_v55 = vld [vmem:[%s1978_s1 + $0xb0] sm:$0xff]  ;;  %v453_v56 = vld [vmem:[%s1502_s13 + $0x518] sm:$0xff] }
  0x77   : > { %762 = vmatprep.subr.mxu0 %v421_v57  ;;  %716 = vmatmul.mubr.f32.gmra.mxu1 %v264_v58  ;;  %v285_v57 = vld [vmem:[%s1978_s1 + $0xf8] sm:$0xff]  ;;  %v452_v58 = vld [vmem:[%s1502_s13 + $0x510] sm:$0xff] }
  0x78   : > { %763 = vmatpush1.msra.mxu0 %v420_v59  ;;  %845 = vmatprep.subr.mxu1 %v491_v60  ;;  %v288_v59 = vld [vmem:[%s1979_s2 + $0x10] sm:$0xff]  ;;  %v451_v60 = vld [vmem:[%s1502_s13 + $0x508] sm:$0xff] }
  0x79   : > { %764 = vmatprep.subr.mxu0 %v419_v61  ;;  %632 = vmatprep.mubr.f32.mxu0 %v271_v62  ;;  %v450_v61 = vld [vmem:[%s1502_s13 + $0x500] sm:$0xff]  ;;  %v284_v62 = vld [vmem:[%s1978_s1 + $0xf0] sm:$0xff]  ;;  %s1856_s13 = scalar_lea.vmem [#allocation2], %s1169_s9 }
  0x7a   : > { %765 = vmatpush1.msra.mxu0 %v418_v63  ;;  %846 = vmatpush1.msra.mxu1 %v490_v0  ;;  %v258_v63 = vld [vmem:[%s1978_s1 + $0x20] sm:$0xff]  ;;  %v267_v0 = vld [vmem:[%s1978_s1 + $0x68] sm:$0xff]  ;;  %s1043_s17 = sshll.u32 %s1856_s13, 4  ;;  %s1890_s17 = int_to_ptr.vmem [resolvable:$true] %s1043_s17 }
  0x7b   : > { %766 = vmatprep.subr.mxu0 %v481_v1  ;;  %633 = vmatmul.mubr.f32.gmra.mxu0 %v270_v2  ;;  %v289_v1 = vld [vmem:[%s1979_s2 + $0x18] sm:$0xff]  ;;  %v266_v2 = vld [vmem:[%s1978_s1 + $0x60] sm:$0xff]  ;;  %s1313_s6 = scalar_lea.vmem %s1890_s17, 1024  ;;  %p1320_p0 = scmp.lt.s32.totalorder %s1890_s17, %s1318_s8 }
  0x7c   : > { %767 = vmatpush2.msra.mxu0 %v480_v3  ;;  %847 = vmatprep.subr.mxu1 %v489_v4  ;;  %v275_v3 = vld [vmem:[%s1978_s1 + $0xa8] sm:$0xff]  ;;  %v274_v4 = vld [vmem:[%s1978_s1 + $0xa0] sm:$0xff]  ;;  %p1314_p11 = scmp.ne.s32.totalorder %s1890_s17, %s1313_s6  ;;  %p1321_p1 = scmp.lt.s32.totalorder %s1319_s10, %s1313_s6 }
  0x7d   : > { %768 = vmatprep.subr.mxu0 %v479_v5  ;;  %721 = vmatprep.mubr.f32.mxu1 %v273_v6  ;;  %v283_v5 = vld [vmem:[%s1978_s1 + $0xe8] sm:$0xff]  ;;  %v282_v6 = vld [vmem:[%s1978_s1 + $0xe0] sm:$0xff] }
  0x7e   : > { %769 = vmatpush2.msra.mxu0 %v478_v7  ;;  %848 = vmatpush1.msra.mxu1 %v488_v8  ;;  %p1315_p12 = pnand %p1314_p11, %p1478_p5  ;;  %p1322_p2 = por %p1321_p1, %p1320_p0 }
  0x7f   : > { %770 = vmatprep.subr.mxu0 %v477_v9  ;;  %722 = vmatmul.mubr.f32.gmra.mxu1 %v272_v10 }
  0x80   : > { %771 = vmatpush2.msra.mxu0 %v476_v11  ;;  %849 = vmatprep.subr.mxu1 %v487_v12  ;;  %p1316_p13 = pneg %p1315_p12 }
  0x81   : > { %772 = vmatprep.subr.mxu0 %v475_v13  ;;  %638 = vmatprep.mubr.f32.mxu0 %v279_v14 }
  0x82   : > { %773 = vmatpush2.msra.mxu0 %v474_v15  ;;  %850 = vmatpush1.msra.mxu1 %v486_v16  ;;  %p1323_p3 = pnand %p1322_p2, %p1316_p13 }
  0x83   : > { %774 = vmatprep.subr.mxu0 %v473_v17  ;;  %639 = vmatmul.mubr.f32.gmra.mxu0 %v278_v18 }
  0x84   : > { %775 = vmatpush2.msra.mxu0 %v472_v19  ;;  %851 = vmatprep.subr.mxu1 %v485_v20 }
  0x85   : > { %776 = vmatprep.subr.mxu0 %v471_v21  ;;  %727 = vmatprep.mubr.f32.mxu1 %v281_v22 }
  0x86   : > { %777 = vmatpush2.msra.mxu0 %v470_v23  ;;  %852 = vmatpush1.msra.mxu1 %v484_v24 }
  0x87   : > { %778 = vmatprep.subr.mxu0 %v469_v25  ;;  %728 = vmatmul.mubr.f32.gmra.mxu1 %v280_v26 }
  0x88   : > { %779 = vmatpush2.msra.mxu0 %v468_v27  ;;  %853 = vmatprep.subr.mxu1 %v483_v28 }
  0x89   : > { %780 = vmatprep.subr.mxu0 %v467_v29  ;;  %854 = vmatpush1.msra.mxu1 %v482_v30 }
  0x8a   : > { %781 = vmatpush2.msra.mxu0 %v466_v31  ;;  %1174 = vmatprep.subr.msk.mxu1 %vm549_vm0, %v515_v32 }
  0x8b   : > { %782 = vmatprep.subr.mxu0 %v465_v33  ;;  %798 = vmatprep.mubr.f32.mxu0 %v259_v34 }
  0x8c   : > { %783 = vmatpush2.msra.mxu0 %v464_v35  ;;  %1175 = vmatpush2.msk.msra.mxu1 %vm549_vm0, %v514_v36 }
  0x8d   : > { %784 = vmatprep.subr.mxu0 %v463_v37  ;;  %1176 = vmatprep.mubr.msk.f32.mxu1 %vm536_vm1, %v261_v38 }
  0x8e   : > { %785 = vmatpush2.msra.mxu0 %v462_v39  ;;  %888 = vmatmul.mubr.f32.vlgmr.msra.gmra.mxu1 %v260_v40 }
  0x8f   : > { %786 = vmatprep.subr.mxu0 %v461_v41  ;;  %1177 = vmatprep.mubr.msk.f32.mxu1 %vm536_vm1, %v269_v42 }
  0x90   : > { %787 = vmatpush2.msra.mxu0 %v460_v43  ;;  %1247 = vset.pattern.permute.xlu0 %v1405_v49 }
  0x91   : > { %788 = vmatprep.subr.mxu0 %v459_v44  ;;  %518 = vperm.xlu0 %1247, %v286_v45  }
  0x92   : > { %789 = vmatpush2.msra.mxu0 %v458_v46  ;;  %894 = vmatmul.mubr.f32.gmra.mxu1 %v268_v47 }
  0x93   : > { %790 = vmatprep.subr.mxu0 %v457_v48  ;;  %1178 = vmatprep.mubr.msk.f32.mxu1 %vm536_vm1, %v277_v50 }
  0x94   : > { %791 = vmatpush2.msra.mxu0 %v456_v51  ;;  %1248 = vset.pattern.permute.xlu1 %v1405_v49 }
  0x95   : > { %792 = vmatprep.subr.mxu0 %v455_v52  ;;  %523 = vperm.xlu0 %1247, %v287_v53  }
  0x96   : > { %793 = vmatpush2.msra.mxu0 %v454_v54  ;;  %900 = vmatmul.mubr.f32.gmra.mxu1 %v276_v55 }
  0x97   : > { %794 = vmatprep.subr.mxu0 %v453_v56  ;;  %1179 = vmatprep.mubr.msk.f32.mxu1 %vm536_vm1, %v285_v57 }
  0x98   : > { %795 = vmatpush2.msra.mxu0 %v452_v58  ;;  %528 = vperm.xlu1 %1248, %v288_v59  }
  0x99   : > { %796 = vmatprep.subr.mxu0 %v451_v60 }
  0x9a   : > { %797 = vmatpush2.msra.mxu0 %v450_v61  ;;  %906 = vmatmul.mubr.f32.gmra.mxu1 %v284_v62 }
  0x9b   : > { %799 = vmatmul.mubr.f32.vlgmr.msra.gmra.mxu0 %v258_v63 }
  0x9c   : > { %804 = vmatprep.mubr.f32.mxu0 %v267_v0  ;;  %533 = vperm.xlu1 %1248, %v289_v1  }
  0x9f   : > { %805 = vmatmul.mubr.f32.gmra.mxu0 %v266_v2 }
  0xa0   : > { %810 = vmatprep.mubr.f32.mxu0 %v275_v3 }
  0xa3   : > { %811 = vmatmul.mubr.f32.gmra.mxu0 %v274_v4 }
  0xa4   : > { %816 = vmatprep.mubr.f32.mxu0 %v283_v5 }
  0xa7   : > { %817 = vmatmul.mubr.f32.gmra.mxu0 %v282_v6 }
 0x10c   : > { %v519_v22 = vpop.permute.xlu0 %518 }
 0x110   : > { %v524_v26 = vpop.permute.xlu0 %523 }
 0x113   : > { %v529_v29 = vpop.permute.xlu1 %528 }
 0x117   : > { %v534_v41 = vpop.permute.xlu1 %533 }
 0x11b   : > { %v622_v11 = vpop.f32.mrf.mxu0 }
 0x11c   : > { %v623_v25 = vadd.f32 %v622_v11, %v519_v22 }
 0x11d   : > { %v711_v7 = vpop.f32.mrf.mxu1  ;;  %v624_v13 = vpop.f32.mrf.mxu0 }
 0x11e   : > { %v625_v28 = vadd.f32 %v624_v13, %v519_v22  ;;  %v712_v31 = vadd.f32 %v711_v7, %v623_v25 }
 0x11f   : > { %v713_v8 = vpop.f32.mrf.mxu1 }
 0x120   : > { %v714_v35 = vadd.f32 %v713_v8, %v625_v28 }
 0x133   : > { %v628_v15 = vpop.f32.mrf.mxu0 }
 0x134   : > { %v629_v32 = vadd.f32 %v628_v15, %v524_v26 }
 0x135   : > { %v630_v17 = vpop.f32.mrf.mxu0 }
 0x136   : > { %v631_v36 = vadd.f32 %v630_v17, %v524_v26 }
 0x137   : > { %v717_v9 = vpop.f32.mrf.mxu1 }
 0x138   : > { %v718_v40 = vadd.f32 %v717_v9, %v629_v32 }
 0x139   : > { %v719_v10 = vpop.f32.mrf.mxu1 }
 0x13a   : > { %v720_v47 = vadd.f32 %v719_v10, %v631_v36 }
 0x13b   : > { %v634_v19 = vpop.f32.mrf.mxu0 }
 0x13c   : > { %v635_v38 = vadd.f32 %v634_v19, %v529_v29 }
 0x13d   : > { %v636_v21 = vpop.f32.mrf.mxu0 }
 0x13e   : > { %v637_v44 = vadd.f32 %v636_v21, %v529_v29 }
 0x13f   : > { %v723_v12 = vpop.f32.mrf.mxu1 }
 0x140   : > { %v724_v51 = vadd.f32 %v723_v12, %v635_v38 }
 0x141   : > { %v725_v14 = vpop.f32.mrf.mxu1 }
 0x142   : > { %v726_v57 = vadd.f32 %v725_v14, %v637_v44 }
 0x143   : > { %v640_v24 = vpop.f32.mrf.mxu0 }
 0x144   : > { %v641_v52 = vadd.f32 %v640_v24, %v534_v41 }
 0x145   : > { %v642_v30 = vpop.f32.mrf.mxu0 }
 0x146   : > { %v643_v58 = vadd.f32 %v642_v30, %v534_v41 }
 0x147   : > { %v729_v16 = vpop.f32.mrf.mxu1 }
 0x148   : > { %v730_v0 = vadd.f32 %v729_v16, %v641_v52  ;;  %v972_v52 = vld [vmem:[%s1842_s14 + $0x20] sm:$0xff] }
 0x149   : > { %v731_v18 = vpop.f32.mrf.mxu1 }
 0x14a   : > { %v732_v5 = vadd.f32 %v731_v18, %v643_v58 }
 0x14e   : > { %v889_v20 = vpop.f32.mrf.mxu1 }
 0x150   : > { %v891_v23 = vpop.f32.mrf.mxu1 }
 0x152   : > { %v895_v27 = vpop.f32.mrf.mxu1 }
 0x154   : > { %v897_v34 = vpop.f32.mrf.mxu1 }
 0x156   : > { %v901_v46 = vpop.f32.mrf.mxu1 }
 0x158   : > { %v903_v60 = vpop.f32.mrf.mxu1 }
 0x15a   : > { %v907_v7 = vpop.f32.mrf.mxu1 }
 0x15b   : > { %v800_v33 = vpop.f32.mrf.mxu0 }
 0x15c   : > { %v801_v37 = vadd.f32 %v800_v33, %v712_v31  ;;  %v909_v15 = vpop.f32.mrf.mxu1  ;;  %v968_v33 = vld [vmem:[%s1842_s14] sm:$0xff] }
 0x15d   : > { %v802_v39 = vpop.f32.mrf.mxu0 }
 0x15e   : > { %v890_v42 = vadd.f32 %v889_v20, %v801_v37  ;;  %v803_v43 = vadd.f32 %v802_v39, %v714_v35  ;;  %v969_v37 = vld [vmem:[%s1842_s14 + $0x8] sm:$0xff] }
 0x15f   : > { %v806_v45 = vpop.f32.mrf.mxu0 }
 0x160   : > { %v1180_v48 = vmul.f32 -1.442695, %v890_v42  ;;  %v892_v49 = vadd.f32 %v891_v23, %v803_v43  ;;  %v807_v50 = vadd.f32 %v806_v45, %v718_v40 }
 0x161   : > { %v808_v53 = vpop.f32.mrf.mxu0 }
 0x162   : > { %1249 = vpow2.f32 %v1180_v48  ;;  %v1181_v54 = vmul.f32 -1.442695, %v892_v49  ;;  %v896_v55 = vadd.f32 %v895_v27, %v807_v50  ;;  %v809_v56 = vadd.f32 %v808_v53, %v720_v47  ;;  %v971_v47 = vld [vmem:[%s1842_s14 + $0x18] sm:$0xff] }
 0x163   : > { %v812_v59 = vpop.f32.mrf.mxu0 }
 0x164   : > { %1251 = vpow2.f32 %v1181_v54  ;;  %v1182_v61 = vmul.f32 -1.442695, %v896_v55  ;;  %v898_v62 = vadd.f32 %v897_v34, %v809_v56  ;;  %v813_v63 = vadd.f32 %v812_v59, %v724_v51 }
 0x165   : > { %v814_v1 = vpop.f32.mrf.mxu0 }
 0x166   : > { %1253 = vpow2.f32 %v1182_v61  ;;  %v1183_v2 = vmul.f32 -1.442695, %v898_v62  ;;  %v902_v3 = vadd.f32 %v901_v46, %v813_v63  ;;  %v815_v4 = vadd.f32 %v814_v1, %v726_v57  ;;  %v973_v57 = vld [vmem:[%s1842_s14 + $0x28] sm:$0xff] }
 0x167   : > { %v818_v6 = vpop.f32.mrf.mxu0 }
 0x168   : > { %1255 = vpow2.f32 %v1183_v2  ;;  %v1184_v8 = vmul.f32 -1.442695, %v902_v3  ;;  %v904_v9 = vadd.f32 %v903_v60, %v815_v4  ;;  %v819_v10 = vadd.f32 %v818_v6, %v730_v0 }
 0x169   : > { %v820_v11 = vpop.f32.mrf.mxu0 }
 0x16a   : > { %1257 = vpow2.f32 %v1184_v8  ;;  %v1185_v12 = vmul.f32 -1.442695, %v904_v9  ;;  %v908_v13 = vadd.f32 %v907_v7, %v819_v10  ;;  %v821_v14 = vadd.f32 %v820_v11, %v732_v5 }
 0x16c   : > { %1259 = vpow2.f32 %v1185_v12  ;;  %v1186_v16 = vmul.f32 -1.442695, %v908_v13  ;;  %v910_v17 = vadd.f32 %v909_v15, %v821_v14 }
 0x16d   : > { %1261 = vtanh.f32 %v890_v42  ;;  %v970_v42 = vld [vmem:[%s1842_s14 + $0x10] sm:$0xff] }
 0x16e   : > { %1263 = vpow2.f32 %v1186_v16  ;;  %v1187_v19 = vmul.f32 -1.442695, %v910_v17 }
 0x16f   : > { %v1250_v18 = vpop.eup %1249  ;;  %1265 = vtanh.f32 %v892_v49 }
 0x170   : > { %v936_v20 = vadd.f32 1.0, %v1250_v18  ;;  %1267 = vpow2.f32 %v1187_v19 }
 0x171   : > { %v1252_v21 = vpop.eup %1251  ;;  %1269 = vtanh.f32 %v896_v55 }
 0x172   : > { %1271 = vrcp.f32 %v936_v20  ;;  %v937_v22 = vadd.f32 1.0, %v1252_v21 }
 0x173   : > { %v1254_v23 = vpop.eup %1253  ;;  %1273 = vtanh.f32 %v898_v62  ;;  %v974_v62 = vld [vmem:[%s1842_s14 + $0x30] sm:$0xff] }
 0x174   : > { %1275 = vrcp.f32 %v937_v22  ;;  %v938_v24 = vadd.f32 1.0, %v1254_v23 }
 0x175   : > { %v1256_v25 = vpop.eup %1255  ;;  %1277 = vtanh.f32 %v902_v3  ;;  %v975_v3 = vld [vmem:[%s1842_s14 + $0x38] sm:$0xff] }
 0x176   : > { %1279 = vrcp.f32 %v938_v24  ;;  %v939_v26 = vadd.f32 1.0, %v1256_v25 }
 0x177   : > { %v1258_v27 = vpop.eup %1257  ;;  %1281 = vtanh.f32 %v904_v9 }
 0x178   : > { %1283 = vrcp.f32 %v939_v26  ;;  %v940_v28 = vadd.f32 1.0, %v1258_v27 }
 0x179   : > { %v1260_v29 = vpop.eup %1259  ;;  %1285 = vtanh.f32 %v908_v13 }
 0x17a   : > { %v1262_v30 = vpop.eup %1261  ;;  %1287 = vrcp.f32 %v940_v28  ;;  %v941_v31 = vadd.f32 1.0, %v1260_v29 }
 0x17b   : > { %v1264_v32 = vpop.eup %1263  ;;  %1289 = vtanh.f32 %v910_v17  ;;  %v976_v39 = vadd.f32 %v1262_v30, %v968_v33 }
 0x17c   : > { %v1266_v34 = vpop.eup %1265  ;;  %1291 = vrcp.f32 %v941_v31  ;;  %v942_v35 = vadd.f32 1.0, %v1264_v32 }
 0x17d   : > { %v1268_v36 = vpop.eup %1267  ;;  %v977_v45 = vadd.f32 %v1266_v34, %v969_v37 }
 0x17e   : > { %v1270_v38 = vpop.eup %1269  ;;  %1293 = vrcp.f32 %v942_v35  ;;  %v943_v40 = vadd.f32 1.0, %v1268_v36 }
 0x17f   : > { %v1272_v41 = vpop.eup %1271  ;;  %v978_v50 = vadd.f32 %v1270_v38, %v970_v42 }
 0x180   : > { %v1274_v43 = vpop.eup %1273  ;;  %v984_v44 = vmul.f32 %v1272_v41, %v976_v39  ;;  %1295 = vrcp.f32 %v943_v40 }
 0x181   : > { %v1851_v46 = vpop.eup %1275  ;;  %v979_v55 = vadd.f32 %v1274_v43, %v971_v47 }
 0x182   : > { %v1278_v48 = vpop.eup %1277  ;;  %992 = vst [vmem:[%s1856_s13] sm:$0xff] %v984_v44  ;;  %1297 = vtanh.f32 %v984_v44  ;;  %v985_v49 = vmul.f32 %v1851_v46, %v977_v45 }
 0x183   : > { %v1860_v51 = vpop.eup %1279  ;;  %v980_v60 = vadd.f32 %v1278_v48, %v972_v52 }
 0x184   : > { %v1282_v53 = vpop.eup %1281  ;;  %993 = vst [vmem:[%s1856_s13 + $0x8] sm:$0xff] %v985_v49  ;;  %1299 = vtanh.f32 %v985_v49  ;;  %v986_v54 = vmul.f32 %v1860_v51, %v978_v50 }
 0x185   : > { %v1865_v56 = vpop.eup %1283  ;;  %v981_v1 = vadd.f32 %v1282_v53, %v973_v57 }
 0x186   : > { %v1286_v58 = vpop.eup %1285  ;;  %994 = vst [vmem:[%s1856_s13 + $0x10] sm:$0xff] %v986_v54  ;;  %1301 = vtanh.f32 %v986_v54  ;;  %v987_v59 = vmul.f32 %v1865_v56, %v979_v55 }
 0x187   : > { %v1870_v61 = vpop.eup %1287  ;;  %v982_v5 = vadd.f32 %v1286_v58, %v974_v62 }
 0x188   : > { %v1290_v63 = vpop.eup %1289  ;;  %995 = vst [vmem:[%s1856_s13 + $0x18] sm:$0xff] %v987_v59  ;;  %1303 = vtanh.f32 %v987_v59  ;;  %v988_v0 = vmul.f32 %v1870_v61, %v980_v60 }
 0x189   : > { %v1875_v2 = vpop.eup %1291  ;;  %v983_v8 = vadd.f32 %v1290_v63, %v975_v3 }
 0x18a   : > { %996 = vst [vmem:[%s1856_s13 + $0x20] sm:$0xff] %v988_v0  ;;  %1305 = vtanh.f32 %v988_v0  ;;  %v989_v4 = vmul.f32 %v1875_v2, %v981_v1 }
 0x18b   : > { %v1294_v6 = vpop.eup %1293 }
 0x18c   : > { %997 = vst [vmem:[%s1856_s13 + $0x28] sm:$0xff] %v989_v4  ;;  %1307 = vtanh.f32 %v989_v4  ;;  %v990_v7 = vmul.f32 %v1294_v6, %v982_v5 }
 0x18d   : > { %v1296_v9 = vpop.eup %1295 }
 0x18e   : > { %998 = vst [vmem:[%s1856_s13 + $0x30] sm:$0xff] %v990_v7  ;;  %1309 = vtanh.f32 %v990_v7  ;;  %v991_v10 = vmul.f32 %v1296_v9, %v983_v8 }
 0x18f   : > { %v1298_v11 = vpop.eup %1297 }
 0x190   : > { %v1008_v12 = vmul.f32 %v1298_v11, %v1272_v41  ;;  %999 = vst [vmem:[%s1856_s13 + $0x38] sm:$0xff] %v991_v10  ;;  %1311 = vtanh.f32 %v991_v10 }
 0x191   : > { %v1300_v13 = vpop.eup %1299 }
 0x192   : > { %1326 = shalt.err (!%p1323_p3)
}
 0x193   : > { %s1327_s11 = scalar_lea.hbm %s1888_s26, 1024  ;;  %s1331_s13 = scalar_lea.hbm %s1981_s4, 2048 }
 0x194   : > { %p1328_p4 = scmp.ne.s32.totalorder %s1888_s26, %s1327_s11  ;;  %p1332_p9 = scmp.lt.s32.totalorder %s1888_s26, %s1981_s4 }
 0x195   : > { %p1333_p10 = scmp.lt.s32.totalorder %s1331_s13, %s1327_s11 }
 0x196   : > { %p1329_p7 = pnand %p1328_p4, %p1478_p5 }
 0x197   : > { %p1334_p11 = por %p1333_p10, %p1332_p9 }
 0x198   : > { %p1330_p8 = pneg %p1329_p7 }
 0x19a   : > { %p1335_p12 = pnand %p1334_p11, %p1330_p8 }
 0x19c   : > { %1338 = shalt.err (!%p1335_p12)
}
 0x19d   : > { %s1407_s6 = smov 256   ;;  %s1408_s7 = smov 16   ;;  %v1009_v14 = vmul.f32 %v1300_v13, %v1851_v46  ;;  %v1302_v15 = vpop.eup %1301 }
 0x19e   : > { %1200 = dma.vmem_to_hbm [thread:$0]  (%p1478_p5), %s1890_s17, 1024, %s1888_s26, %s1025_s30, %s1407_s6, %s1407_s6, %s1408_s7   ;;  %v1010_v16 = vmul.f32 %v1302_v15, %v1860_v51  ;;  %v1304_v17 = vpop.eup %1303 }
 0x19f   : > { %s243_s8 = scalar_lea.vmem [#allocation4], %s1169_s9  ;;  %v1011_v19 = vmul.f32 %v1304_v17, %v1865_v56  ;;  %v1306_v18 = vpop.eup %1305  ;;  %s1932_s30 = scalar_lea.hbm %s1982_s5, %s1197_s16 }
 0x1a0   : > { %1016 = vst [vmem:[%s243_s8] sm:$0xff] %v1008_v12  ;;  %1017 = vst [vmem:[%s243_s8 + $0x8] sm:$0xff] %v1009_v14  ;;  %v1012_v20 = vmul.f32 %v1306_v18, %v1870_v61  ;;  %v1308_v21 = vpop.eup %1307  ;;  %s1059_s9 = sshll.u32 %s243_s8, 4  ;;  %s1030_s10 = scalar_lea.sflag [#allocation5], %s1845_s15  ;;  %s1934_s9 = int_to_ptr.vmem [resolvable:$true] %s1059_s9 }
 0x1a1   : > { %1018 = vst [vmem:[%s243_s8 + $0x10] sm:$0xff] %v1010_v16  ;;  %1019 = vst [vmem:[%s243_s8 + $0x18] sm:$0xff] %v1011_v19  ;;  %v1013_v22 = vmul.f32 %v1308_v21, %v1875_v2  ;;  %v1310_v23 = vpop.eup %1309  ;;  %s1339_s11 = scalar_lea.vmem %s1934_s9, 1024  ;;  %s1409_s12 = smov [#allocation4]  }
 0x1a2   : > { %1020 = vst [vmem:[%s243_s8 + $0x20] sm:$0xff] %v1012_v20  ;;  %v1014_v24 = vmul.f32 %v1310_v23, %v1294_v6  ;;  %v1312_v25 = vpop.eup %1311  ;;  %p1340_p13 = scmp.ne.s32.totalorder %s1934_s9, %s1339_s11  ;;  %s1343_s14 = sshll.u32 %s1409_s12, 4  ;;  %s1344_s14 = int_to_ptr.vmem [resolvable:$false] %s1343_s14 }
 0x1a3   : > { %1021 = vst [vmem:[%s243_s8 + $0x28] sm:$0xff] %v1013_v22  ;;  %v1015_v26 = vmul.f32 %v1312_v25, %v1296_v9  ;;  %s1345_s22 = scalar_lea.vmem %s1344_s14, 2048  ;;  %p1346_p2 = scmp.lt.s32.totalorder %s1934_s9, %s1344_s14 }
 0x1a4   : > { %1022 = vst [vmem:[%s243_s8 + $0x30] sm:$0xff] %v1014_v24  ;;  %p1341_p0 = pnand %p1340_p13, %p1478_p5  ;;  %p1347_p3 = scmp.lt.s32.totalorder %s1345_s22, %s1339_s11 }
 0x1a5   : > { %1023 = vst [vmem:[%s243_s8 + $0x38] sm:$0xff] %v1015_v26 }
 0x1a6   : > { %p1342_p1 = pneg %p1341_p0  ;;  %p1348_p4 = por %p1347_p3, %p1346_p2 }
 0x1a8   : > { %p1349_p7 = pnand %p1348_p4, %p1342_p1 }
 0x1aa   : > { %1352 = shalt.err (!%p1349_p7)
}
 0x1ab   : > { %s1353_s16 = scalar_lea.hbm %s1932_s30, 1024  ;;  %s1357_s23 = scalar_lea.hbm %s1982_s5, 2048 }
 0x1ac   : > { %p1354_p8 = scmp.ne.s32.totalorder %s1932_s30, %s1353_s16  ;;  %p1358_p11 = scmp.lt.s32.totalorder %s1932_s30, %s1982_s5 }
 0x1ad   : > { %p1359_p12 = scmp.lt.s32.totalorder %s1357_s23, %s1353_s16 }
 0x1ae   : > { %p1355_p9 = pnand %p1354_p8, %p1478_p5 }
 0x1af   : > { %p1360_p13 = por %p1359_p12, %p1358_p11 }
 0x1b0   : > { %p1356_p10 = pneg %p1355_p9 }
 0x1b2   : > { %p1361_p0 = pnand %p1360_p13, %p1356_p10 }
 0x1b4   : > { %1364 = shalt.err (!%p1361_p0)
}
 0x1b5   : > { %1201 = dma.vmem_to_hbm [thread:$0]  (%p1478_p5), %s1934_s9, 1024, %s1932_s30, %s1030_s10, %s1407_s6, %s1407_s6, %s1408_s7  }
 0x1b6 PF: > { %p1211_p1 = scmp.ge.s32.totalorder %s1403_s21, 2  ;;  %s1074_s17 = sand.u32 1, %s1391_s18  }
 0x1b7   : > { %s1075_s26 = scalar_lea.sflag [#allocation3], %s1074_s17 }
 0x1b8   : > { %p1205_p2 = pnand %p1211_p1, %p1482_p6 }
 0x1ba   : > { %p1206_p3 = pneg %p1205_p2 }
 0x1bc   : > { %1382 = dma.done.wait (%p1206_p3), %s1075_s26, 1024  }
 0x1bd   : > { %1384 = vsyncadd (%p1206_p3), %s1075_s26, 4294966272  ;;  %s1084_s11 = scalar_lea.sflag [#allocation5], %s1074_s17 }
 0x1be   : > { %1386 = dma.done.wait (%p1206_p3), %s1084_s11, 1024  }
 0x1bf   : > { %1388 = vsyncadd (%p1206_p3), %s1084_s11, 4294966272  ;;  %p19_p5 = scmp.ge.s32.totalorder %s1465_s24, 4   ;;  %s1985_s18 = smov %s1395_s19 }
 0x1c0   : > { %s1986_s19 = smov %s1399_s20  ;;  %s1987_s20 = smov %s1476_s27 }
 0x1c1   : > { %s1988_s21 = smov %s1465_s24  ;;  %21 = sbr.rel (!%p19_p5) target bundleno = 5 (0x5), region = 91 }
 0x1c6   :  { %1089 = vsyncpa [#allocation3], 1 }
 0x1c7   :  { %1091 = vsyncpa [#allocation3 + $0x1], 1 }
 0x1c8   :  { %1092 = vsyncpa [#allocation5], 1 }
 0x1c9   :  { %1094 = vsyncpa [#allocation5 + $0x1], 1 }

</bundles_post_ra>
